<compile_context>
chip_gen: v7x
topology: tpu7x:2x2x1
jax: 0.10.0
libtpu: 0.0.40
codegen_flags: <defaults>
</compile_context>

<pallas_src>
import numpy as np
import jax
import jax.numpy as jnp
from jax.experimental import pallas as pl
from jax.experimental.pallas import tpu as pltpu


GROUP = 4                 # blocks packed per row -> 256 lanes (lane-dense)
LANES = 64 * GROUP
MIN_ROWS_PER_STEP = 512   # keep >= ~512-row blocks (amortize per-step overhead)
VMEM_LIMIT_BYTES = 48 << 20


def _round_up(x: int, mult: int) -> int:
    return ((x + mult - 1) // mult) * mult


def _make_basis(blocks: int) -> jnp.ndarray:
    """Block-diagonal (64*blocks, 64*blocks) DCT basis with JPEG scale folded in.

    `x_flat @ basis` reproduces `scale * DCT(x)` for `blocks` packed 8x8 blocks,
    where x_flat packs each block row-major as (x*8 + y) and the output packs
    coefficients as (u*8 + v).
    """
    t = np.zeros((8, 8, 8, 8), dtype=np.float64)
    for x in range(8):
        for y in range(8):
            for u in range(8):
                for v in range(8):
                    t[x, y, u, v] = (
                        np.cos((2 * x + 1) * u * np.pi / 16)
                        * np.cos((2 * y + 1) * v * np.pi / 16)
                    )
    alpha = np.array([1.0 / np.sqrt(2)] + [1.0] * 7)
    scale = np.outer(alpha, alpha) * 0.25

    t64 = t.reshape(64, 64) * scale.reshape(1, 64)   # fold scale into the basis
    n = 64 * blocks
    big = np.zeros((n, n), dtype=np.float32)
    for j in range(blocks):
        big[j * 64:(j + 1) * 64, j * 64:(j + 1) * 64] = t64.astype(np.float32)
    return jnp.asarray(big)


def _dct_kernel_dense(x_ref, t_ref, o_ref):
    # x_ref: (tm, 256) packed 8x8 blocks; t_ref: (256, 256) block-diag basis.
    # Center in-kernel (-128): VPU subtract is free under the MXU and avoids
    # the cancellation of a folded DC bias.
    x = x_ref[...] - 128.0
    o_ref[...] = jnp.dot(x, t_ref[...], preferred_element_type=jnp.float32)


def _dct_kernel_split(x_ref, t_ref, o_ref):
    # v5e path: exploit block-diagonal structure — two tile-aligned 128-K dots
    # against a single (128,128) basis (halves MXU passes vs. the dense 256-K
    # dot on 128x128 MXUs). Slices at lane offsets 0/128 are tile-aligned.
    t = t_ref[...]
    o_ref[:, :128] = jnp.dot(x_ref[:, :128] - 128.0, t,
                             preferred_element_type=jnp.float32)
    o_ref[:, 128:] = jnp.dot(x_ref[:, 128:] - 128.0, t,
                             preferred_element_type=jnp.float32)


def _is_v5() -> bool:
    try:
        kind = jax.devices()[0].device_kind.lower()
    except Exception:
        return False
    return "v5" in kind


def dct8x8(image, *, tm: int = 4096):
    """image: (batch, num_blocks, 8, 8) -> (batch, num_blocks, 8, 8) float32."""
    b, n, h, w = image.shape
    assert h == 8 and w == 8
    image = image.astype(jnp.float32)
    m = b * n

    # Always lane-dense: pad the flat (m, 64) view so the packed row count is a
    # multiple of 8 sublanes (m multiple of GROUP*8 = 32). Padding cost is
    # <= 31 blocks (~8 KiB) and avoids masked stores / partial sublane blocks.
    m_pad = _round_up(m, GROUP * 8)
    x_flat = image.reshape(m, 64)
    if m_pad != m:
        x_flat = jnp.pad(x_flat, ((0, m_pad - m), (0, 0)))
    m_rows = m_pad // GROUP
    x2 = x_flat.reshape(m_rows, LANES)   # contiguous reshape, no extra copy

    if _is_v5():
        basis = _make_basis(2)           # (128, 128)
        kernel = _dct_kernel_split
    else:
        basis = _make_basis(GROUP)       # (256, 256)
        kernel = _dct_kernel_dense
    t_shape = basis.shape

    # Tile / grid selection:
    #  * >= 2 steps (pipelining) once blocks can stay >= MIN_ROWS_PER_STEP rows,
    #    targeting 4 steps (2 TCs x 2 pipelined steps on v7x).
    #  * cap tile at `tm` rows; with lanes=256 and f32 a 4096-row tile is 4 MiB,
    #    double-buffered in+out ~16 MiB — covered by the explicit VMEM limit.
    #  * prefer an even step count so ("parallel",) balances v7x's 2 TCs.
    if m_rows < 2 * MIN_ROWS_PER_STEP:
        tm_eff = _round_up(m_rows, 8)
    else:
        n_steps = max(2, min(4, m_rows // MIN_ROWS_PER_STEP))
        tm_eff = min(tm, _round_up(pl.cdiv(m_rows, n_steps), 8))
    grid_n = pl.cdiv(m_rows, tm_eff)
    if grid_n > 1 and grid_n % 2 == 1:
        tm_eff = max(8, _round_up(pl.cdiv(m_rows, grid_n + 1), 8))
        grid_n = pl.cdiv(m_rows, tm_eff)

    out2 = pl.pallas_call(
        kernel,
        out_shape=jax.ShapeDtypeStruct((m_rows, LANES), jnp.float32),
        grid_spec=pltpu.PrefetchScalarGridSpec(
            num_scalar_prefetch=0,
            grid=(grid_n,),
            in_specs=[
                pl.BlockSpec((tm_eff, LANES), lambda i: (i, 0)),   # X tile
                pl.BlockSpec(t_shape, lambda i: (0, 0)),           # resident basis
            ],
            out_specs=pl.BlockSpec((tm_eff, LANES), lambda i: (i, 0)),
        ),
        compiler_params=pltpu.CompilerParams(
            dimension_semantics=("parallel",),      # shards across v7x's 2 TCs
            vmem_limit_bytes=VMEM_LIMIT_BYTES,
        ),
    )(x2, basis)

    out_flat = out2.reshape(m_pad, 64)[:m]
    return out_flat.reshape(b, n, 8, 8)


def _reference(image):
    """Exact (float64 numpy) reference matching the PyTorch forward."""
    t = np.zeros((8, 8, 8, 8), dtype=np.float64)
    for x in range(8):
        for y in range(8):
            for u in range(8):
                for v in range(8):
                    t[x, y, u, v] = (
                        np.cos((2 * x + 1) * u * np.pi / 16)
                        * np.cos((2 * y + 1) * v * np.pi / 16)
                    )
    alpha = np.array([1.0 / np.sqrt(2)] + [1.0] * 7)
    scale = np.outer(alpha, alpha) * 0.25
    x = np.asarray(image, dtype=np.float64) - 128.0
    res = np.tensordot(x, t, axes=2)
    return (scale * res).astype(np.float32)


if __name__ == "__main__":
    key = jax.random.PRNGKey(0)
    k1, k2 = jax.random.split(key)

    # Main case: (batch=2, num_blocks=16) pixel-like values in [0, 255].
    batch, num_blocks = 2, 16
    image = jax.random.uniform(
        k1, (batch, num_blocks, 8, 8), dtype=jnp.float32, minval=0.0, maxval=255.0
    )
    out = jax.block_until_ready(dct8x8(image))
    assert out.shape == image.shape and out.dtype == jnp.float32
    np.testing.assert_allclose(np.asarray(out), _reference(image),
                               rtol=1e-4, atol=1e-2)

    # Odd block count -> exercises the pad-to-lane-dense path (no group=1 fallback).
    image_odd = jax.random.uniform(
        k2, (1, 3, 8, 8), dtype=jnp.float32, minval=0.0, maxval=255.0
    )
    out_odd = jax.block_until_ready(dct8x8(image_odd))
    assert out_odd.shape == image_odd.shape
    np.testing.assert_allclose(np.asarray(out_odd), _reference(image_odd),
                               rtol=1e-4, atol=1e-2)

    print("KERNEL_OK")
</pallas_src>

<mosaic_0001>
module attributes {stable_mosaic.version = 11 : i64} {
  func.func @_dct_kernel_dense(%arg0: i32, %arg1: memref<8x256xf32, #tpu.memory_space<vmem>>, %arg2: memref<256x256xf32, #tpu.memory_space<vmem>>, %arg3: memref<8x256xf32, #tpu.memory_space<vmem>>) attributes {dimension_semantics = [#tpu.dimension_semantics<parallel>], iteration_bounds = array<i64: 1>, scalar_prefetch = 0 : i64, scratch_operands = 0 : i64, tpu.core_type = #tpu.core_type<tc>, window_params = [{transform_indices = @transform_0, window_bounds = array<i64: 8, 256>}, {pipeline_mode = #tpu.pipeline_mode<synchronous>, transform_indices = @transform_1, window_bounds = array<i64: 256, 256>}, {transform_indices = @transform_2, window_bounds = array<i64: 8, 256>}]} {
    %c0 = arith.constant 0 : index
    %c0_0 = arith.constant 0 : index
    %0 = vector.load %arg1[%c0, %c0_0] : memref<8x256xf32, #tpu.memory_space<vmem>>, vector<8x256xf32>
    %cst = arith.constant 1.280000e+02 : f32
    %1 = vector.broadcast %cst : f32 to vector<8x256xf32>
    %2 = arith.subf %0, %1 : vector<8x256xf32>
    %c0_1 = arith.constant 0 : index
    %c0_2 = arith.constant 0 : index
    %3 = vector.load %arg2[%c0_1, %c0_2] : memref<256x256xf32, #tpu.memory_space<vmem>>, vector<256x256xf32>
    %cst_3 = arith.constant dense<0.000000e+00> : vector<8x256xf32>
    %4 = tpu.matmul %2, %3, %cst_3 {dimension_numbers = #tpu.dot_dimension_numbers<[1], [0], [0], [1], [0, 0, 1, 1], [], []>} : vector<8x256xf32>, vector<256x256xf32>, vector<8x256xf32> -> vector<8x256xf32>
    %c0_4 = arith.constant 0 : index
    %c0_5 = arith.constant 0 : index
    %5 = vector.load %arg3[%c0_4, %c0_5] : memref<8x256xf32, #tpu.memory_space<vmem>>, vector<8x256xf32>
    tpu.vector_store %arg3[%c0_4, %c0_5], %4 {strides = array<i32>} : memref<8x256xf32, #tpu.memory_space<vmem>>, vector<8x256xf32>,
    return
  }
  func.func @transform_0(%arg0: i32) -> (i32, i32) {
    %c0_i32 = arith.constant 0 : i32
    %c0_i32_0 = arith.constant 0 : i32
    return %arg0, %c0_i32 : i32, i32
  }
  func.func @transform_1(%arg0: i32) -> (i32, i32) {
    %c0_i32 = arith.constant 0 : i32
    %c0_i32_0 = arith.constant 0 : i32
    %c0_i32_1 = arith.constant 0 : i32
    return %c0_i32, %c0_i32_0 : i32, i32
  }
  func.func @transform_2(%arg0: i32) -> (i32, i32) {
    %c0_i32 = arith.constant 0 : i32
    %c0_i32_0 = arith.constant 0 : i32
    return %arg0, %c0_i32 : i32, i32
  }
}

</mosaic_0001>

<bundles_post_ra>
// kernel: tpu_custom_call.1
= control target key start
LH: loop header
LB: loop body
LE: loop exit
PB: predicated region body
PF: predicated region fallthrough
CT: control target
= control target key end

     0   :  { %7 = vsyncpa [#allocation3], 0  ;;  %s401_s0 = inlined_call_operand.hbm [shape: f32[8,256], index: 0, kind: input, shape index: {}]   ;;  %s402_s1 = inlined_call_operand.hbm [shape: f32[256,256], index: 1, kind: input, shape index: {}]   ;;  %s403_s2 = inlined_call_operand.hbm [shape: f32[8,256], index: 2, kind: output, shape index: {}]  }
   0x1   :  { %8 = vsyncpa [#allocation6], 0 }
   0x2   :  { %9 = vsyncpa [#allocation4], 0  ;;  %s338_s9 = smov [#allocation2]   ;;  %s339_s11 = smov [#allocation5]  }
   0x3   :  { %s16_s10 = sshll.u32 %s338_s9, 4  ;;  %s25_s12 = sshll.u32 %s339_s11, 4  ;;  %s17_s10 = int_to_ptr.vmem [resolvable:$true] %s16_s10  ;;  %s358_s12 = int_to_ptr.vmem [resolvable:$true] %s25_s12 }
   0x4   :  { %s266_s15 = scalar_lea.hbm %s401_s0, 256 }
   0x5   :  { %p267_p0 = scmp.ne.s32.totalorder %s401_s0, %s266_s15  ;;  %p270_p1 = scmp.lt.u32.totalorder %s266_s15, %s401_s0 }
   0x7   :  { %p272_p2 = pnand %p270_p1, %p267_p0 }
   0x9   :  { %275 = shalt.err (!%p272_p2)
}
   0xa   :  { %s276_s20 = scalar_lea.vmem %s17_s10, 256  ;;  %p281_p4 = scmp.lt.s32.totalorder %s17_s10, %s17_s10 }
   0xb   :  { %p277_p3 = scmp.ne.s32.totalorder %s17_s10, %s276_s20  ;;  %p282_p5 = scmp.lt.s32.totalorder %s276_s20, %s276_s20 }
   0xd   :  { %p283_p6 = por %p282_p5, %p281_p4 }
   0xf   :  { %p284_p7 = pnand %p283_p6, %p277_p3 }
  0x11   :  { %287 = shalt.err (!%p284_p7)
}
  0x12   :  { %19 = dma.hbm_to_vmem [thread:$0]  %s401_s0, 256, %s17_s10, [#allocation3]  }
  0x13   :  { %s288_s25 = scalar_lea.hbm %s402_s1, 8192 }
  0x14   :  { %p289_p8 = scmp.ne.s32.totalorder %s402_s1, %s288_s25  ;;  %p292_p9 = scmp.lt.u32.totalorder %s288_s25, %s402_s1 }
  0x16   :  { %p294_p10 = pnand %p292_p9, %p289_p8 }
  0x18   :  { %297 = shalt.err (!%p294_p10)
}
  0x19   :  { %s298_s30 = scalar_lea.vmem %s358_s12, 8192  ;;  %p303_p12 = scmp.lt.s32.totalorder %s358_s12, %s358_s12 }
  0x1a   :  { %p299_p11 = scmp.ne.s32.totalorder %s358_s12, %s298_s30  ;;  %p304_p13 = scmp.lt.s32.totalorder %s298_s30, %s298_s30 }
  0x1c   :  { %p305_p0 = por %p304_p13, %p303_p12 }
  0x1e   :  { %p306_p1 = pnand %p305_p0, %p299_p11 }
  0x20   :  { %309 = shalt.err (!%p306_p1)
}
  0x21   :  { %s340_s0 = smov 256   ;;  %s341_s3 = smov 16  }
  0x22   :  { %31 = dma.hbm_to_vmem [thread:$0]  %s402_s1, 8192, %s358_s12, [#allocation6], %s340_s0, %s340_s0, %s341_s3  }
  0x23   :  { %332 = dma.done.wait [#allocation3], 256  }
  0x24   :  { %333 = vsyncadd [#allocation3], 4294967040 }
  0x25   :  { %334 = dma.done.wait [#allocation6], 8192  }
  0x26   :  { %335 = vsyncadd [#allocation6], 4294959104  ;;  %v43_v0 = vld [vmem:[#allocation5 + $0x8] sm:$0xff]  ;;  %v45_v1 = vld [vmem:[#allocation5 + $0x18] sm:$0xff]  ;;  %s342_s1 = smov [#allocation7]  }
  0x27   :  { %v42_v2 = vld [vmem:[#allocation5] sm:$0xff]  ;;  %v197_v3 = vpack.c.bf16 %v45_v1, %v43_v0  ;;  %v44_v4 = vld [vmem:[#allocation5 + $0x10] sm:$0xff]  ;;  %v47_v5 = vld [vmem:[#allocation5 + $0x28] sm:$0xff]  ;;  %s185_s6 = sshll.u32 %s342_s1, 4  ;;  %s186_s6 = int_to_ptr.vmem [resolvable:$true] %s185_s6 }
  0x28   :  { %v49_v6 = vld [vmem:[#allocation5 + $0x38] sm:$0xff]  ;;  %v199_v7 = vpack.c.bf16 %v44_v4, %v42_v2  ;;  %v46_v9 = vld [vmem:[#allocation5 + $0x20] sm:$0xff]  ;;  %v48_v10 = vld [vmem:[#allocation5 + $0x30] sm:$0xff]  ;;  %s310_s7 = scalar_lea.vmem %s186_s6, 256  ;;  %p315_p3 = scmp.lt.s32.totalorder %s186_s6, %s186_s6 }
  0x29   :  { %v201_v8 = vpack.c.bf16 %v49_v6, %v47_v5  ;;  %v51_v11 = vld [vmem:[#allocation5 + $0x48] sm:$0xff]  ;;  %198 = vmatprep.subr.bf16.mxu0 %v197_v3  ;;  %v53_v12 = vld [vmem:[#allocation5 + $0x58] sm:$0xff]  ;;  %v203_v13 = vpack.c.bf16 %v48_v10, %v46_v9  ;;  %v50_v15 = vld [vmem:[#allocation5 + $0x40] sm:$0xff]  ;;  %p311_p2 = scmp.ne.s32.totalorder %s186_s6, %s310_s7  ;;  %p316_p4 = scmp.lt.s32.totalorder %s310_s7, %s310_s7 }
  0x2a   :  { %200 = vmatpush1.bf16.msra.mxu0 %v199_v7  ;;  %v205_v14 = vpack.c.bf16 %v53_v12, %v51_v11  ;;  %v52_v16 = vld [vmem:[#allocation5 + $0x50] sm:$0xff]  ;;  %v55_v17 = vld [vmem:[#allocation5 + $0x68] sm:$0xff]  ;;  %v57_v18 = vld [vmem:[#allocation5 + $0x78] sm:$0xff] }
  0x2b   :  { %202 = vmatprep.subr.bf16.mxu0 %v201_v8  ;;  %v207_v19 = vpack.c.bf16 %v52_v16, %v50_v15  ;;  %v209_v20 = vpack.c.bf16 %v57_v18, %v55_v17  ;;  %v54_v21 = vld [vmem:[#allocation5 + $0x60] sm:$0xff]  ;;  %v56_v22 = vld [vmem:[#allocation5 + $0x70] sm:$0xff]  ;;  %v59_v23 = vld [vmem:[#allocation5 + $0x88] sm:$0xff]  ;;  %p317_p5 = por %p316_p4, %p315_p3 }
  0x2c   :  { %v61_v24 = vld [vmem:[#allocation5 + $0x98] sm:$0xff]  ;;  %v211_v25 = vpack.c.bf16 %v56_v22, %v54_v21  ;;  %v58_v27 = vld [vmem:[#allocation5 + $0x80] sm:$0xff]  ;;  %v60_v28 = vld [vmem:[#allocation5 + $0x90] sm:$0xff] }
  0x2d   :  { %v213_v26 = vpack.c.bf16 %v61_v24, %v59_v23  ;;  %v63_v29 = vld [vmem:[#allocation5 + $0xa8] sm:$0xff]  ;;  %v65_v30 = vld [vmem:[#allocation5 + $0xb8] sm:$0xff]  ;;  %v215_v31 = vpack.c.bf16 %v60_v28, %v58_v27  ;;  %v62_v33 = vld [vmem:[#allocation5 + $0xa0] sm:$0xff]  ;;  %p318_p6 = pnand %p317_p5, %p311_p2 }
  0x2e   :  { %204 = vmatpush1.bf16.msra.mxu0 %v203_v13  ;;  %v217_v32 = vpack.c.bf16 %v65_v30, %v63_v29  ;;  %v64_v34 = vld [vmem:[#allocation5 + $0xb0] sm:$0xff]  ;;  %v67_v35 = vld [vmem:[#allocation5 + $0xc8] sm:$0xff]  ;;  %v69_v36 = vld [vmem:[#allocation5 + $0xd8] sm:$0xff] }
  0x2f   :  { %206 = vmatprep.subr.bf16.mxu0 %v205_v14  ;;  %v219_v37 = vpack.c.bf16 %v64_v34, %v62_v33  ;;  %v221_v38 = vpack.c.bf16 %v69_v36, %v67_v35  ;;  %v66_v39 = vld [vmem:[#allocation5 + $0xc0] sm:$0xff]  ;;  %v68_v40 = vld [vmem:[#allocation5 + $0xd0] sm:$0xff]  ;;  %v39_v41 = vld [vmem:[#allocation2 + $0x8] sm:$0xff] }
  0x30   :  { %v71_v42 = vld [vmem:[#allocation5 + $0xe8] sm:$0xff]  ;;  %v73_v43 = vld [vmem:[#allocation5 + $0xf8] sm:$0xff]  ;;  %v196_v44 = vadd.f32 -128.0, %v39_v41  ;;  %v223_v45 = vpack.c.bf16 %v68_v40, %v66_v39  ;;  %v70_v47 = vld [vmem:[#allocation5 + $0xe0] sm:$0xff] }
  0x31   :  { %v225_v46 = vpack.c.bf16 %v73_v43, %v71_v42  ;;  %v72_v48 = vld [vmem:[#allocation5 + $0xf0] sm:$0xff]  ;;  %v75_v49 = vld [vmem:[#allocation5 + $0x108] sm:$0xff]  ;;  %v77_v50 = vld [vmem:[#allocation5 + $0x118] sm:$0xff] }
  0x32   :  { %208 = vmatpush1.bf16.msra.mxu0 %v207_v19  ;;  %170 = vmatprep.mubr.f32.mxu0 %v196_v44  ;;  %v227_v51 = vpack.c.bf16 %v72_v48, %v70_v47  ;;  %v229_v52 = vpack.c.bf16 %v77_v50, %v75_v49  ;;  %v74_v53 = vld [vmem:[#allocation5 + $0x100] sm:$0xff]  ;;  %v76_v54 = vld [vmem:[#allocation5 + $0x110] sm:$0xff]  ;;  %v79_v55 = vld [vmem:[#allocation5 + $0x128] sm:$0xff] }
  0x33   :  { %210 = vmatprep.subr.bf16.mxu0 %v209_v20  ;;  %v81_v56 = vld [vmem:[#allocation5 + $0x138] sm:$0xff]  ;;  %v231_v57 = vpack.c.bf16 %v76_v54, %v74_v53  ;;  %v78_v59 = vld [vmem:[#allocation5 + $0x120] sm:$0xff]  ;;  %v80_v60 = vld [vmem:[#allocation5 + $0x130] sm:$0xff] }
  0x34   :  { %v233_v58 = vpack.c.bf16 %v81_v56, %v79_v55  ;;  %v83_v61 = vld [vmem:[#allocation5 + $0x148] sm:$0xff]  ;;  %v85_v62 = vld [vmem:[#allocation5 + $0x158] sm:$0xff]  ;;  %v235_v63 = vpack.c.bf16 %v80_v60, %v78_v59  ;;  %v82_v1 = vld [vmem:[#allocation5 + $0x140] sm:$0xff] }
  0x35   :  { %v237_v0 = vpack.c.bf16 %v85_v62, %v83_v61  ;;  %v84_v2 = vld [vmem:[#allocation5 + $0x150] sm:$0xff]  ;;  %v87_v3 = vld [vmem:[#allocation5 + $0x168] sm:$0xff]  ;;  %v89_v4 = vld [vmem:[#allocation5 + $0x178] sm:$0xff] }
  0x36   :  { %212 = vmatpush1.bf16.msra.mxu0 %v211_v25  ;;  %v239_v5 = vpack.c.bf16 %v84_v2, %v82_v1  ;;  %v241_v6 = vpack.c.bf16 %v89_v4, %v87_v3  ;;  %v86_v7 = vld [vmem:[#allocation5 + $0x160] sm:$0xff]  ;;  %v88_v8 = vld [vmem:[#allocation5 + $0x170] sm:$0xff]  ;;  %v91_v9 = vld [vmem:[#allocation5 + $0x188] sm:$0xff] }
  0x37   :  { %214 = vmatprep.subr.bf16.mxu0 %v213_v26  ;;  %v93_v10 = vld [vmem:[#allocation5 + $0x198] sm:$0xff]  ;;  %v243_v11 = vpack.c.bf16 %v88_v8, %v86_v7  ;;  %v90_v13 = vld [vmem:[#allocation5 + $0x180] sm:$0xff]  ;;  %v92_v14 = vld [vmem:[#allocation5 + $0x190] sm:$0xff] }
  0x38   :  { %v245_v12 = vpack.c.bf16 %v93_v10, %v91_v9  ;;  %v95_v15 = vld [vmem:[#allocation5 + $0x1a8] sm:$0xff]  ;;  %v97_v16 = vld [vmem:[#allocation5 + $0x1b8] sm:$0xff]  ;;  %v247_v17 = vpack.c.bf16 %v92_v14, %v90_v13  ;;  %v94_v19 = vld [vmem:[#allocation5 + $0x1a0] sm:$0xff] }
  0x39   :  { %v249_v18 = vpack.c.bf16 %v97_v16, %v95_v15  ;;  %v96_v20 = vld [vmem:[#allocation5 + $0x1b0] sm:$0xff]  ;;  %v99_v21 = vld [vmem:[#allocation5 + $0x1c8] sm:$0xff]  ;;  %v101_v22 = vld [vmem:[#allocation5 + $0x1d8] sm:$0xff] }
  0x3a   :  { %216 = vmatpush1.bf16.msra.mxu0 %v215_v31  ;;  %v251_v23 = vpack.c.bf16 %v96_v20, %v94_v19  ;;  %v253_v24 = vpack.c.bf16 %v101_v22, %v99_v21  ;;  %v98_v25 = vld [vmem:[#allocation5 + $0x1c0] sm:$0xff]  ;;  %v100_v26 = vld [vmem:[#allocation5 + $0x1d0] sm:$0xff]  ;;  %v103_v27 = vld [vmem:[#allocation5 + $0x1e8] sm:$0xff] }
  0x3b   :  { %218 = vmatprep.subr.bf16.mxu0 %v217_v32  ;;  %v105_v28 = vld [vmem:[#allocation5 + $0x1f8] sm:$0xff]  ;;  %v255_v29 = vpack.c.bf16 %v100_v26, %v98_v25  ;;  %v102_v31 = vld [vmem:[#allocation5 + $0x1e0] sm:$0xff]  ;;  %v104_v32 = vld [vmem:[#allocation5 + $0x1f0] sm:$0xff] }
  0x3c   :  { %v257_v30 = vpack.c.bf16 %v105_v28, %v103_v27  ;;  %v259_v33 = vpack.c.bf16 %v104_v32, %v102_v31  ;;  %v38_v34 = vld [vmem:[#allocation2] sm:$0xff] }
  0x3d   :  { %v195_v35 = vadd.f32 -128.0, %v38_v34 }
  0x3e   :  { %220 = vmatpush1.bf16.msra.mxu0 %v219_v37 }
  0x3f   :  { %222 = vmatprep.subr.bf16.mxu0 %v221_v38 }
  0x42   :  { %224 = vmatpush1.bf16.msra.mxu0 %v223_v45 }
  0x43   :  { %226 = vmatprep.subr.bf16.mxu0 %v225_v46 }
  0x46   :  { %228 = vmatpush1.bf16.msra.mxu0 %v227_v51 }
  0x47   :  { %230 = vmatprep.subr.bf16.mxu0 %v229_v52 }
  0x4a   :  { %232 = vmatpush1.bf16.msra.mxu0 %v231_v57 }
  0x4b   :  { %234 = vmatprep.subr.bf16.mxu0 %v233_v58 }
  0x4e   :  { %236 = vmatpush1.bf16.msra.mxu0 %v235_v63 }
  0x4f   :  { %238 = vmatprep.subr.bf16.mxu0 %v237_v0 }
  0x52   :  { %240 = vmatpush1.bf16.msra.mxu0 %v239_v5 }
  0x53   :  { %242 = vmatprep.subr.bf16.mxu0 %v241_v6 }
  0x56   :  { %244 = vmatpush1.bf16.msra.mxu0 %v243_v11 }
  0x57   :  { %246 = vmatprep.subr.bf16.mxu0 %v245_v12 }
  0x5a   :  { %248 = vmatpush1.bf16.msra.mxu0 %v247_v17 }
  0x5b   :  { %250 = vmatprep.subr.bf16.mxu0 %v249_v18 }
  0x5e   :  { %252 = vmatpush1.bf16.msra.mxu0 %v251_v23 }
  0x5f   :  { %254 = vmatprep.subr.bf16.mxu0 %v253_v24 }
  0x62   :  { %256 = vmatpush1.bf16.msra.mxu0 %v255_v29 }
  0x63   :  { %258 = vmatprep.subr.bf16.mxu0 %v257_v30 }
  0x66   :  { %260 = vmatpush1.bf16.msra.mxu0 %v259_v33 }
  0x69   :  { %171 = vmatmul.mubr.f32.vlgmr.msra.gmra.mrb[0].mxu0 %v195_v35 }
 0x13c   :  { %v172_v36 = vpop.f32.mrb[0].mxu0 }
 0x13d   :  { %177 = vst [vmem:[#allocation7] sm:$0xff] %v172_v36  ;;  %v174_v37 = vpop.f32.mrb[1].mxu0 }
 0x13e   :  { %178 = vst [vmem:[#allocation7 + $0x8] sm:$0xff] %v174_v37 }
 0x13f   :  { %321 = shalt.err (!%p318_p6)
}
 0x140   :  { %s322_s10 = scalar_lea.hbm %s403_s2, 256 }
 0x141   :  { %p323_p7 = scmp.ne.s32.totalorder %s403_s2, %s322_s10  ;;  %p326_p8 = scmp.lt.u32.totalorder %s322_s10, %s403_s2 }
 0x143   :  { %p328_p9 = pnand %p326_p8, %p323_p7 }
 0x145   :  { %331 = shalt.err (!%p328_p9)
}
 0x146   :  { %188 = dma.vmem_to_hbm [thread:$0]  %s186_s6, 256, %s403_s2, [#allocation4]  }
 0x147   :  { %336 = dma.done.wait [#allocation4], 256  }
 0x148   :  { %337 = vsyncadd [#allocation4], 4294967040 }
 0x149   :  { %192 = vsyncpa [#allocation3], 1 }
 0x14a   :  { %193 = vsyncpa [#allocation6], 1 }
 0x14b   :  { %194 = vsyncpa [#allocation4], 1 }

</bundles_post_ra>
